<compile_context>
chip_gen: v6e
topology: v6e:2x2x1
jax: 0.10.0
libtpu: 0.0.40
codegen_flags: <defaults>
</compile_context>

<pallas_src>
import functools

import jax
import jax.numpy as jnp
from jax.experimental import pallas as pl
from jax.experimental.pallas import tpu as pltpu


def _mlp_kernel(xT_ref, w1_ref, b1_ref, w2_ref, b2_ref, outT_ref, *, compute_dtype):
    # xT_ref  : (F, TN)  lane-tile of x^T
    # w1_ref  : (H, F)   first layer weight, torch layout (out, in)
    # b1_ref  : (H, 1)   first layer bias (column vector -> broadcasts on lanes)
    # w2_ref  : (C, H)   second layer weight
    # b2_ref  : (C, 1)   second layer bias
    # outT_ref: (C, TN)  lane-tile of out^T
    xT = xT_ref[...].astype(compute_dtype)
    w1 = w1_ref[...].astype(compute_dtype)
    w2 = w2_ref[...].astype(compute_dtype)

    # Layer 0: Linear(in_feats -> h_feats) + ReLU  (MXU, f32 accumulate).
    h = jnp.dot(w1, xT, preferred_element_type=jnp.float32)
    h = jnp.maximum(h + b1_ref[...], 0.0)

    # dropout_rate == 0 -> nn.Identity (nothing to do).
    # TODO(synk): dropout_rate > 0 would need pltpu.prng_seed/prng_random_bits.

    # Layer 1: Linear(h_feats -> num_classes), no activation on the last layer.
    o = jnp.dot(w2, h.astype(compute_dtype), preferred_element_type=jnp.float32)
    outT_ref[...] = (o + b2_ref[...]).astype(outT_ref.dtype)


def _round_up(v, m):
    return ((v + m - 1) // m) * m


@functools.partial(jax.jit, static_argnames=("tn_max", "bf16_matmul"))
def mlp_forward_fm(xT, w1, b1, w2, b2, *, tn_max=32768, bf16_matmul=False):
    """Fused 2-layer MLP on feature-major data (kernel-native fast path).

    xT : (F, N) float32 (or bf16) -- x transposed, produced upstream.
    w1 : (H, F), b1 : (H, 1), w2 : (C, H), b2 : (C, 1) -- torch nn.Linear layout.
    Returns out^T : (C, N).
    """
    f, n = xT.shape
    h_feats = w1.shape[0]
    c = w2.shape[0]

    # Lane tile along N.  Tiny problems use a single full block (block dims ==
    # array dims, so the (8,128) constraint is satisfied without padding).
    # Otherwise use the biggest tile that (a) keeps double-buffered tiles +
    # compute scratch comfortably inside VMEM and (b) leaves >= 2 grid steps
    # so both v7x TensorCores get work.
    if n <= 256:
        tn = n
    else:
        tn = min(tn_max, _round_up(pl.cdiv(n, 2), 128))
    grid = (pl.cdiv(n, tn),)  # ragged grid: OOB output writes are masked

    compute_dtype = jnp.bfloat16 if bf16_matmul else xT.dtype
    kernel = functools.partial(_mlp_kernel, compute_dtype=compute_dtype)

    return pl.pallas_call(
        kernel,
        out_shape=jax.ShapeDtypeStruct((c, n), xT.dtype),
        grid_spec=pl.GridSpec(
            grid=grid,
            in_specs=[
                pl.BlockSpec((f, tn), lambda i: (0, i)),        # x^T, lane-tiled
                pl.BlockSpec((h_feats, f), lambda i: (0, 0)),   # W1, VMEM-resident
                pl.BlockSpec((h_feats, 1), lambda i: (0, 0)),   # b1
                pl.BlockSpec((c, h_feats), lambda i: (0, 0)),   # W2
                pl.BlockSpec((c, 1), lambda i: (0, 0)),         # b2
            ],
            out_specs=pl.BlockSpec((c, tn), lambda i: (0, i)),  # out^T, lane-dense
        ),
        compiler_params=pltpu.CompilerParams(
            dimension_semantics=("parallel",),
            vmem_limit_bytes=32 * 1024 * 1024,   # covers v5e's 16 MiB default
        ),
    )(xT, w1, b1, w2, b2)


@functools.partial(jax.jit, static_argnames=("tn_max", "bf16_matmul"))
def mlp_forward(x, w1, b1, w2, b2, *, tn_max=32768, bf16_matmul=False):
    """Torch-layout convenience wrapper: x (N, F) -> (N, C).

    Pays one extra HBM pass to transpose x (plus a transpose of the tiny
    (C, N) output); prefer `mlp_forward_fm` with producer-side feature-major
    data for large N.
    """
    outT = mlp_forward_fm(x.T, w1, b1, w2, b2, tn_max=tn_max, bf16_matmul=bf16_matmul)
    return outT.T


def init_mlp_params(key, in_feats, h_feats=32, num_classes=2):
    """Deterministic init matching torch.nn.Linear's U(-1/sqrt(fan_in), +).

    Weights kept in torch layout (out_features, in_features); biases as
    column vectors (out_features, 1) for lane-broadcast inside the kernel.
    """
    k1, k2, k3, k4 = jax.random.split(key, 4)
    bound1 = 1.0 / jnp.sqrt(in_feats)
    bound2 = 1.0 / jnp.sqrt(h_feats)
    w1 = jax.random.uniform(k1, (h_feats, in_feats), jnp.float32, -bound1, bound1)
    b1 = jax.random.uniform(k2, (h_feats, 1), jnp.float32, -bound1, bound1)
    w2 = jax.random.uniform(k3, (num_classes, h_feats), jnp.float32, -bound2, bound2)
    b2 = jax.random.uniform(k4, (num_classes, 1), jnp.float32, -bound2, bound2)
    return w1, b1, w2, b2


def _ref_mlp(x, w1, b1, w2, b2):
    # Pure-JAX reference in the original (row-major) orientation.
    return jnp.maximum(x @ w1.T + b1.T, 0.0) @ w2.T + b2.T


if __name__ == "__main__":
    # x is the [N, in_feats] node-feature matrix (is_graph=False path; the
    # is_graph=True branch only pulls `h.ndata['feature']` out of a DGL graph,
    # which is host-side glue outside the kernel).
    IN_FEATS, H_FEATS, NUM_CLASSES = 16, 32, 2

    key = jax.random.PRNGKey(0)
    kx, kp, kx2 = jax.random.split(key, 3)
    w1, b1, w2, b2 = init_mlp_params(kp, IN_FEATS, H_FEATS, NUM_CLASSES)

    # 1) Small torch-layout check (single full block, block dims == array dims).
    N = 16
    x = jax.random.normal(kx, (N, IN_FEATS), jnp.float32)
    out = jax.block_until_ready(mlp_forward(x, w1, b1, w2, b2))
    ref = _ref_mlp(x, w1, b1, w2, b2)
    assert out.shape == (N, NUM_CLASSES)
    assert jnp.allclose(out, ref, atol=1e-5, rtol=1e-5)

    # 2) Feature-major fast path with ragged N (no pad, no wrapper transpose):
    #    exercises a multi-step "parallel" grid and a masked partial last block.
    N2 = 1000
    x2 = jax.random.normal(kx2, (N2, IN_FEATS), jnp.float32)
    x2T = x2.T  # producer-side feature-major layout
    out2T = jax.block_until_ready(mlp_forward_fm(x2T, w1, b1, w2, b2))
    ref2 = _ref_mlp(x2, w1, b1, w2, b2)
    assert out2T.shape == (NUM_CLASSES, N2)
    assert jnp.allclose(out2T.T, ref2, atol=1e-5, rtol=1e-5)

    # 3) Opt-in bf16 matmul inputs (f32 accumulate) -- mainly a v5e MXU relief;
    #    checked with looser tolerance since it intentionally changes numerics.
    out3T = jax.block_until_ready(
        mlp_forward_fm(x2T, w1, b1, w2, b2, bf16_matmul=True))
    assert out3T.shape == (NUM_CLASSES, N2)
    assert jnp.allclose(out3T.T, ref2, atol=5e-2, rtol=5e-2)

    print("KERNEL_OK")
</pallas_src>

<mosaic_0001>
module attributes {stable_mosaic.version = 11 : i64} {
  func.func @_mlp_kernel(%arg0: i32, %arg1: memref<16x16xf32, #tpu.memory_space<vmem>>, %arg2: memref<32x16xf32, #tpu.memory_space<vmem>>, %arg3: memref<32x1xf32, #tpu.memory_space<vmem>>, %arg4: memref<2x32xf32, #tpu.memory_space<vmem>>, %arg5: memref<2x1xf32, #tpu.memory_space<vmem>>, %arg6: memref<2x16xf32, #tpu.memory_space<vmem>>) attributes {dimension_semantics = [#tpu.dimension_semantics<parallel>], iteration_bounds = array<i64: 1>, scalar_prefetch = 0 : i64, scratch_operands = 0 : i64, tpu.core_type = #tpu.core_type<tc>, window_params = [{transform_indices = @transform_0, window_bounds = array<i64: 16, 16>}, {pipeline_mode = #tpu.pipeline_mode<synchronous>, transform_indices = @transform_1, window_bounds = array<i64: 32, 16>}, {pipeline_mode = #tpu.pipeline_mode<synchronous>, transform_indices = @transform_2, window_bounds = array<i64: 32, 1>}, {pipeline_mode = #tpu.pipeline_mode<synchronous>, transform_indices = @transform_3, window_bounds = array<i64: 2, 32>}, {pipeline_mode = #tpu.pipeline_mode<synchronous>, transform_indices = @transform_4, window_bounds = array<i64: 2, 1>}, {transform_indices = @transform_5, window_bounds = array<i64: 2, 16>}]} {
    %c0 = arith.constant 0 : index
    %c0_0 = arith.constant 0 : index
    %0 = vector.load %arg1[%c0, %c0_0] : memref<16x16xf32, #tpu.memory_space<vmem>>, vector<16x16xf32>
    %c0_1 = arith.constant 0 : index
    %c0_2 = arith.constant 0 : index
    %1 = vector.load %arg2[%c0_1, %c0_2] : memref<32x16xf32, #tpu.memory_space<vmem>>, vector<32x16xf32>
    %c0_3 = arith.constant 0 : index
    %c0_4 = arith.constant 0 : index
    %2 = vector.load %arg4[%c0_3, %c0_4] : memref<2x32xf32, #tpu.memory_space<vmem>>, vector<2x32xf32>
    %cst = arith.constant dense<0.000000e+00> : vector<32x16xf32>
    %3 = tpu.matmul %1, %0, %cst {dimension_numbers = #tpu.dot_dimension_numbers<[1], [0], [0], [1], [0, 0, 1, 1], [], []>} : vector<32x16xf32>, vector<16x16xf32>, vector<32x16xf32> -> vector<32x16xf32>
    %c0_5 = arith.constant 0 : index
    %c0_6 = arith.constant 0 : index
    %4 = vector.load %arg3[%c0_5, %c0_6] : memref<32x1xf32, #tpu.memory_space<vmem>>, vector<32x1xf32>
    %5 = vector.broadcast %4 : vector<32x1xf32> to vector<32x16xf32>
    %6 = arith.addf %3, %5 : vector<32x16xf32>
    %cst_7 = arith.constant 0.000000e+00 : f32
    %7 = vector.broadcast %cst_7 : f32 to vector<32x16xf32>
    %8 = arith.maximumf %6, %7 : vector<32x16xf32>
    %cst_8 = arith.constant dense<0.000000e+00> : vector<2x16xf32>
    %9 = tpu.matmul %2, %8, %cst_8 {dimension_numbers = #tpu.dot_dimension_numbers<[1], [0], [0], [1], [0, 0, 1, 1], [], []>} : vector<2x32xf32>, vector<32x16xf32>, vector<2x16xf32> -> vector<2x16xf32>
    %c0_9 = arith.constant 0 : index
    %c0_10 = arith.constant 0 : index
    %10 = vector.load %arg5[%c0_9, %c0_10] : memref<2x1xf32, #tpu.memory_space<vmem>>, vector<2x1xf32>
    %11 = vector.broadcast %10 : vector<2x1xf32> to vector<2x16xf32>
    %12 = arith.addf %9, %11 : vector<2x16xf32>
    %c0_11 = arith.constant 0 : index
    %c0_12 = arith.constant 0 : index
    %13 = vector.load %arg6[%c0_11, %c0_12] : memref<2x16xf32, #tpu.memory_space<vmem>>, vector<2x16xf32>
    tpu.vector_store %arg6[%c0_11, %c0_12], %12 {strides = array<i32>} : memref<2x16xf32, #tpu.memory_space<vmem>>, vector<2x16xf32>,
    return
  }
  func.func @transform_0(%arg0: i32) -> (i32, i32) {
    %c0_i32 = arith.constant 0 : i32
    %c0_i32_0 = arith.constant 0 : i32
    return %c0_i32, %arg0 : i32, i32
  }
  func.func @transform_1(%arg0: i32) -> (i32, i32) {
    %c0_i32 = arith.constant 0 : i32
    %c0_i32_0 = arith.constant 0 : i32
    %c0_i32_1 = arith.constant 0 : i32
    return %c0_i32, %c0_i32_0 : i32, i32
  }
  func.func @transform_2(%arg0: i32) -> (i32, i32) {
    %c0_i32 = arith.constant 0 : i32
    %c0_i32_0 = arith.constant 0 : i32
    %c0_i32_1 = arith.constant 0 : i32
    return %c0_i32, %c0_i32_0 : i32, i32
  }
  func.func @transform_3(%arg0: i32) -> (i32, i32) {
    %c0_i32 = arith.constant 0 : i32
    %c0_i32_0 = arith.constant 0 : i32
    %c0_i32_1 = arith.constant 0 : i32
    return %c0_i32, %c0_i32_0 : i32, i32
  }
  func.func @transform_4(%arg0: i32) -> (i32, i32) {
    %c0_i32 = arith.constant 0 : i32
    %c0_i32_0 = arith.constant 0 : i32
    %c0_i32_1 = arith.constant 0 : i32
    return %c0_i32, %c0_i32_0 : i32, i32
  }
  func.func @transform_5(%arg0: i32) -> (i32, i32) {
    %c0_i32 = arith.constant 0 : i32
    %c0_i32_0 = arith.constant 0 : i32
    return %c0_i32, %arg0 : i32, i32
  }
}

</mosaic_0001>

<bundles_post_ra>
// kernel: mlp_forward_fm.1
= control target key start
LH: loop header
LB: loop body
LE: loop exit
PB: predicated region body
PF: predicated region fallthrough
CT: control target
= control target key end

     0   :  { %vm52_vm0 = vcmask 130048   ;;  %v315_v4 = vmov 0   ;;  %s392_s0 = inlined_call_operand.vmem [shape: f32[16,16], index: 0, kind: input, shape index: {}]   ;;  %s393_s1 = inlined_call_operand.vmem [shape: f32[32,16], index: 1, kind: input, shape index: {}]   ;;  %s394_s2 = inlined_call_operand.vmem [shape: f32[32,1], index: 2, kind: input, shape index: {}]   ;;  %s395_s3 = inlined_call_operand.vmem [shape: f32[2,32], index: 3, kind: input, shape index: {}]   ;;  %s396_s4 = inlined_call_operand.vmem [shape: f32[2,1], index: 4, kind: input, shape index: {}]   ;;  %s397_s5 = inlined_call_operand.hbm [shape: f32[2,16], index: 5, kind: output, shape index: {}]  }
   0x1   :  { %v22_v0 = vld [vmem:[%s392_s0 + $0x8] sm:$0xff]  ;;  %v21_v1 = vld [vmem:[%s392_s0] sm:$0xff]  ;;  %291 = vset.pattern.permute.xlu0 %v315_v4  ;;  %v31_v5 = vld [vmem:[%s394_s2 + $0x18] sm:$0xff] }
   0x2   :  { %v23_v2 = vld [vmem:[%s393_s1] sm:$0xff]  ;;  %266 = vmatprep.subr.mxu0 %v22_v0  ;;  %v24_v3 = vld [vmem:[%s393_s1 + $0x8] sm:$0xff]  ;;  %v25_v7 = vld [vmem:[%s393_s1 + $0x10] sm:$0xff]  ;;  %49 = vperm.xlu0 %291, %v31_v5  }
   0x3   :  { %270 = vmatprep.mubr.msk.f32.mxu0 %vm52_vm0, %v23_v2  ;;  %267 = vmatpush3.msra.mxu0 %v22_v0  ;;  %v29_v6 = vld [vmem:[%s394_s2 + $0x8] sm:$0xff] }
   0x4   :  { %268 = vmatprep.subr.mxu0 %v21_v1 }
   0x5   :  { %10 = vsyncpa [#allocation3], 0  ;;  %269 = vmatpush3.msra.mxu0 %v21_v1  ;;  %292 = vset.pattern.permute.xlu1 %v315_v4  ;;  %v30_v8 = vld [vmem:[%s394_s2 + $0x10] sm:$0xff]  ;;  %v26_v9 = vld [vmem:[%s393_s1 + $0x18] sm:$0xff]  ;;  %v316_v12 = vmov 0.0   ;;  %vm317_vm1 = vmmov 0  }
   0x6   :  { %271 = vmatmul.mubr.msk.f32.vlgmr.msra.gmra.mxu0 %vm52_vm0, %v24_v3  ;;  %39 = vperm.xlu1 %292, %v29_v6   ;;  %v28_v10 = vld [vmem:[%s394_s2] sm:$0xff]  ;;  %vm160_vm2 = vcmask 261120   ;;  %vm234_vm3 = vcmask 123904  }
   0x7   :  { %273 = vmatprep.mubr.msk.f32.mxu0 %vm52_vm0, %v25_v7  ;;  %44 = vperm.xlu0 %291, %v30_v8   ;;  %v154_v11 = vld [vmem:[%s396_s4] sm:$0x3]  ;;  %s318_s4 = smov [#allocation2]  }
   0x8   :  { %276 = vmatprep.subr.mxu1 %v316_v12  ;;  %284 = vmatprep.mubr.msk.f32.mxu1 %vm317_vm1, %v316_v12  ;;  %v27_v29 = vld [vmem:[%s395_s3] sm:$0x3]  ;;  %s242_s14 = sshll.u32 %s318_s4, 4  ;;  %s243_s14 = int_to_ptr.vmem [resolvable:$true] %s242_s14 }
   0x9   :  { %s293_s15 = scalar_lea.vmem %s243_s14, 32  ;;  %p298_p1 = scmp.lt.s32.totalorder %s243_s14, %s243_s14 }
   0xa   :  { %274 = vmatmul.mubr.msk.f32.gmra.mxu0 %vm52_vm0, %v26_v9  ;;  %34 = vperm.xlu1 %292, %v28_v10   ;;  %p294_p0 = scmp.ne.s32.totalorder %s243_s14, %s293_s15  ;;  %p299_p2 = scmp.lt.s32.totalorder %s293_s15, %s293_s15 }
   0xb   :  { %157 = vperm.xlu0 %291, %v154_v11  }
   0xc   :  { %p300_p3 = por %p299_p2, %p298_p1 }
   0xe   :  { %p301_p4 = pnand %p300_p3, %p294_p0 }
  0x7d   :  { %v50_v13 = vpop.permute.xlu0 %49 }
  0x81   :  { %v40_v14 = vpop.permute.xlu1 %39 }
  0x82   :  { %v45_v18 = vpop.permute.xlu0 %44 }
  0x85   :  { %v35_v20 = vpop.permute.xlu1 %34 }
  0x86   :  { %v158_v30 = vpop.permute.xlu0 %157 }
  0xc6   :  { %v272_v15 = vpop.f32.mrf.mxu0 }
  0xc7   :  { %v137_v22 = vadd.f32 %v272_v15, %v40_v14 }
  0xc8   :  { %v131_v16 = vpop.f32.mrf.mxu0 }
  0xc9   :  { %v132_v25 = vadd.f32 %v131_v16, %v35_v20  ;;  %v151_v27 = vmax.f32 %v137_v22, 0.0 }
  0xca   :  { %v275_v17 = vpop.f32.mrf.mxu0 }
  0xcb   :  { %v147_v19 = vadd.f32 %v275_v17, %v50_v13  ;;  %v150_v28 = vmax.f32 %v132_v25, 0.0 }
  0xcc   :  { %v141_v21 = vpop.f32.mrf.mxu0 }
  0xcd   :  { %v153_v23 = vmax.f32 %v147_v19, 0.0  ;;  %v142_v24 = vadd.f32 %v141_v21, %v45_v18 }
  0xcf   :  { %v152_v26 = vmax.f32 %v142_v24, 0.0  ;;  %277 = vmatpush3.msra.mxu1 %v153_v23 }
  0xd0   :  { %278 = vmatprep.subr.mxu1 %v316_v12 }
  0xd1   :  { %279 = vmatpush3.msra.mxu1 %v152_v26 }
  0xd2   :  { %280 = vmatprep.subr.mxu1 %v316_v12 }
  0xd3   :  { %281 = vmatpush3.msra.mxu1 %v151_v27 }
  0xd4   :  { %282 = vmatprep.subr.mxu1 %v316_v12 }
  0xd5   :  { %283 = vmatpush3.msra.mxu1 %v150_v28 }
  0xd6   :  { %285 = vmatmul.mubr.msk.f32.vlgmr.msra.gmra.mxu1 %vm160_vm2, %v27_v29 }
 0x196   :  { %v230_v31 = vpop.f32.mrf.mxu1 }
 0x197   :  { %v231_v32 = vadd.f32 %v230_v31, %v158_v30 }
 0x198   :  { %v286_v33 = vpop.f32.mrf.mxu1 }
 0x199   :  { %235 = vst.msk [vmem:[#allocation2] sm:$0x3] %vm234_vm3, %v231_v32 }
 0x19a   :  { %304 = shalt.err (!%p301_p4)
}
 0x19b   :  { %245 = dma.vmem_to_hbm [thread:$0]  %s243_s14, 32, %s397_s5, [#allocation3]  }
 0x19c   :  { %313 = dma.done.wait [#allocation3], 32  }
 0x19d   :  { %314 = vsyncadd [#allocation3], 4294967264 }
 0x19e   :  { %249 = vsyncpa [#allocation3], 1 }

</bundles_post_ra>
